<compile_context>
chip_gen: v6e
topology: v6e:2x2x1
jax: 0.10.0
libtpu: 0.0.40
codegen_flags: <defaults>
</compile_context>

<pallas_src>
import functools

import jax
import jax.numpy as jnp
from jax.experimental import pallas as pl
from jax.experimental.pallas import tpu as pltpu

HID1 = 128
HID2 = 256


def _round_up(n, m):
    return ((n + m - 1) // m) * m


def _leaky_relu(x, slope=0.2):
    # Exactly LeakyReLU for 0 < slope < 1: a single VPU max.
    return jnp.maximum(x, jnp.asarray(slope, x.dtype) * x)


def generator_kernel(x_ref, w1_ref, b1_ref, w2_ref, b2_ref, w3_ref, b3_ref, o_ref):
    # x tile arrives as f32 straight from HBM; the bf16 cast happens here on
    # the VPU (free under the DMA-bound regime) instead of a wrapper HBM pass.
    x = x_ref[...].astype(jnp.bfloat16)
    h1 = jnp.dot(x, w1_ref[...], preferred_element_type=jnp.float32) + b1_ref[...]
    h1 = _leaky_relu(h1.astype(jnp.bfloat16))      # bf16 VPU (2x packing v6e/v7x)
    h2 = jnp.dot(h1, w2_ref[...], preferred_element_type=jnp.float32) + b2_ref[...]
    h2 = _leaky_relu(h2.astype(jnp.bfloat16))
    out = jnp.dot(h2, w3_ref[...], preferred_element_type=jnp.float32) + b3_ref[...]
    o_ref[...] = out.astype(o_ref.dtype)


def _vmem_bytes(bb, input_dim, output_dim, out_bytes):
    """Rough per-core VMEM footprint for one pipelined step."""
    x_tile = bb * input_dim * 4                                   # f32 input tile
    o_tile = bb * output_dim * out_bytes                          # output tile
    weights = 2 * (input_dim * HID1 + HID1 * HID2 + HID2 * output_dim)   # bf16
    biases = 4 * (HID1 + HID2 + output_dim)                       # f32
    acts = bb * (HID1 + HID2) * (4 + 2)      # f32 accumulators + bf16 copies
    # Inputs/outputs double-buffered by the BlockSpec pipeline.
    return 2 * (x_tile + o_tile + weights + biases) + acts


def _choose_block_b(B, block_b, input_dim, output_dim, out_bytes,
                    vmem_budget=28 * 1024 * 1024, target_steps=4):
    if B <= 256:
        # Tiny batch: one full tile; grid=(1,) is unavoidable and harmless.
        return B
    # >= target_steps grid steps: lets the pipeline overlap x-prefetch /
    # out-writeback with MXU work and gives both v7x TensorCores work.
    # Keep bb a multiple of 16 for bf16 sublane packing.
    bb = min(block_b, _round_up(pl.cdiv(B, target_steps), 16))
    # Cap so double-buffered tiles + resident weights fit v7x's 64 MiB VMEM.
    while bb > 256 and _vmem_bytes(bb, input_dim, output_dim, out_bytes) > vmem_budget:
        bb = _round_up(bb // 2, 16)
    return max(bb, 16)


@functools.partial(jax.jit, static_argnames=("block_b", "out_dtype"))
def generator_forward(x, params, block_b=2048, out_dtype=jnp.bfloat16):
    """x: [B, input_dim] float32. params: dict of [in, out]-layout weights.

    Returns [B, output_dim] in `out_dtype` (bf16 by default; pass
    out_dtype=jnp.float32 for bit-closer PyTorch parity)."""
    B, input_dim = x.shape
    w1, b1 = params["w1"], params["b1"]
    w2, b2 = params["w2"], params["b2"]
    w3, b3 = params["w3"], params["b3"]
    output_dim = w3.shape[1]
    out_bytes = jnp.dtype(out_dtype).itemsize

    # Weights/biases are tiny and batch-independent: one cheap cast here, then
    # they stay VMEM-resident across grid steps (constant index_map).
    w1b, w2b, w3b = (w.astype(jnp.bfloat16) for w in (w1, w2, w3))
    b1f = b1.reshape(1, HID1).astype(jnp.float32)
    b2f = b2.reshape(1, HID2).astype(jnp.float32)
    b3f = b3.reshape(1, output_dim).astype(jnp.float32)

    bb = _choose_block_b(B, block_b, input_dim, output_dim, out_bytes)
    grid = (pl.cdiv(B, bb),)
    # NOTE: a partial last tile (B % bb != 0) is correct — Pallas pads the
    # out-of-range rows of the x block and clips the output block write.

    full2 = lambda shape: pl.BlockSpec(shape, lambda i: (0, 0))

    flops = 2 * B * (input_dim * HID1 + HID1 * HID2 + HID2 * output_dim)
    bytes_accessed = (B * input_dim * 4 + B * output_dim * out_bytes
                      + 2 * (input_dim * HID1 + HID1 * HID2 + HID2 * output_dim)
                      + 4 * (HID1 + HID2 + output_dim))

    vmem_limit = int(min(60 * 1024 * 1024,
                         max(16 * 1024 * 1024,
                             2 * _vmem_bytes(bb, input_dim, output_dim, out_bytes))))

    return pl.pallas_call(
        generator_kernel,
        out_shape=jax.ShapeDtypeStruct((B, output_dim), out_dtype),
        grid_spec=pltpu.PrefetchScalarGridSpec(
            num_scalar_prefetch=0,
            grid=grid,
            in_specs=[
                pl.BlockSpec((bb, input_dim), lambda i: (i, 0)),    # x tile (f32)
                full2((input_dim, HID1)), full2((1, HID1)),         # layer 1
                full2((HID1, HID2)), full2((1, HID2)),              # layer 2
                full2((HID2, output_dim)), full2((1, output_dim)),  # layer 3
            ],
            out_specs=pl.BlockSpec((bb, output_dim), lambda i: (i, 0)),
        ),
        compiler_params=pltpu.CompilerParams(
            dimension_semantics=("parallel",),       # megacore-shardable axis
            vmem_limit_bytes=vmem_limit,             # derived from footprint
        ),
        cost_estimate=pl.CostEstimate(
            flops=flops, transcendentals=0, bytes_accessed=bytes_accessed),
    )(x, w1b, b1f, w2b, b2f, w3b, b3f)


def init_params(key, input_dim, output_dim):
    """Deterministic init mimicking PyTorch Linear (uniform ±1/sqrt(fan_in)).

    Weights are stored transposed: [in_features, out_features]."""
    ks = jax.random.split(key, 6)

    def lin(kw, kb, fan_in, fan_out):
        bound = 1.0 / jnp.sqrt(fan_in)
        w = jax.random.uniform(kw, (fan_in, fan_out), jnp.float32, -bound, bound)
        b = jax.random.uniform(kb, (1, fan_out), jnp.float32, -bound, bound)
        return w, b

    w1, b1 = lin(ks[0], ks[1], input_dim, HID1)
    w2, b2 = lin(ks[2], ks[3], HID1, HID2)
    w3, b3 = lin(ks[4], ks[5], HID2, output_dim)
    return {"w1": w1, "b1": b1, "w2": w2, "b2": b2, "w3": w3, "b3": b3}


def generator_ref(x, p):
    """Pure-JAX f32 reference matching PyTorch semantics."""
    h1 = jax.nn.leaky_relu(x @ p["w1"] + p["b1"], 0.2)
    h2 = jax.nn.leaky_relu(h1 @ p["w2"] + p["b2"], 0.2)
    return h2 @ p["w3"] + p["b3"]


if __name__ == "__main__":
    key = jax.random.PRNGKey(0)
    k_x, k_p, k_x2 = jax.random.split(key, 3)

    batch, input_dim, output_dim = 8, 32, 64
    params = init_params(k_p, input_dim, output_dim)

    # Small batch: single-tile path.
    x = jax.random.normal(k_x, (batch, input_dim), jnp.float32)
    out = jax.block_until_ready(generator_forward(x, params))
    ref = generator_ref(x, params)
    assert out.shape == (batch, output_dim), out.shape
    # bf16 MXU operands + bf16 output (f32 accumulation) -> loose tolerance.
    assert jnp.allclose(out.astype(jnp.float32), ref, atol=5e-2, rtol=5e-2), \
        "small-batch mismatch vs reference"

    # Larger batch: exercises the multi-step grid + partial last tile path.
    batch2 = 300
    x2 = jax.random.normal(k_x2, (batch2, input_dim), jnp.float32)
    out2 = jax.block_until_ready(generator_forward(x2, params))
    ref2 = generator_ref(x2, params)
    assert out2.shape == (batch2, output_dim), out2.shape
    assert jnp.allclose(out2.astype(jnp.float32), ref2, atol=5e-2, rtol=5e-2), \
        "tiled-batch mismatch vs reference"

    print("KERNEL_OK")
</pallas_src>

<mosaic_0001>
module attributes {stable_mosaic.version = 11 : i64} {
  func.func @generator_kernel(%arg0: i32, %arg1: memref<8x32xf32, #tpu.memory_space<vmem>>, %arg2: memref<32x128xbf16, #tpu.memory_space<vmem>>, %arg3: memref<1x128xf32, #tpu.memory_space<vmem>>, %arg4: memref<128x256xbf16, #tpu.memory_space<vmem>>, %arg5: memref<1x256xf32, #tpu.memory_space<vmem>>, %arg6: memref<256x64xbf16, #tpu.memory_space<vmem>>, %arg7: memref<1x64xf32, #tpu.memory_space<vmem>>, %arg8: memref<8x64xbf16, #tpu.memory_space<vmem>>) attributes {dimension_semantics = [#tpu.dimension_semantics<parallel>], iteration_bounds = array<i64: 1>, scalar_prefetch = 0 : i64, scratch_operands = 0 : i64, tpu.core_type = #tpu.core_type<tc>, window_params = [{transform_indices = @transform_0, window_bounds = array<i64: 8, 32>}, {pipeline_mode = #tpu.pipeline_mode<synchronous>, transform_indices = @transform_1, window_bounds = array<i64: 32, 128>}, {pipeline_mode = #tpu.pipeline_mode<synchronous>, transform_indices = @transform_2, window_bounds = array<i64: 1, 128>}, {pipeline_mode = #tpu.pipeline_mode<synchronous>, transform_indices = @transform_3, window_bounds = array<i64: 128, 256>}, {pipeline_mode = #tpu.pipeline_mode<synchronous>, transform_indices = @transform_4, window_bounds = array<i64: 1, 256>}, {pipeline_mode = #tpu.pipeline_mode<synchronous>, transform_indices = @transform_5, window_bounds = array<i64: 256, 64>}, {pipeline_mode = #tpu.pipeline_mode<synchronous>, transform_indices = @transform_6, window_bounds = array<i64: 1, 64>}, {transform_indices = @transform_7, window_bounds = array<i64: 8, 64>}]} {
    %c0 = arith.constant 0 : index
    %c0_0 = arith.constant 0 : index
    %0 = vector.load %arg1[%c0, %c0_0] : memref<8x32xf32, #tpu.memory_space<vmem>>, vector<8x32xf32>
    %1 = arith.truncf %0 : vector<8x32xf32> to vector<8x32xbf16>
    %c0_1 = arith.constant 0 : index
    %c0_2 = arith.constant 0 : index
    %2 = vector.load %arg2[%c0_1, %c0_2] : memref<32x128xbf16, #tpu.memory_space<vmem>>, vector<32x128xbf16>
    %cst = arith.constant dense<0.000000e+00> : vector<8x128xf32>
    %3 = tpu.matmul %1, %2, %cst {dimension_numbers = #tpu.dot_dimension_numbers<[1], [0], [0], [1], [0, 0, 1, 1], [], []>} : vector<8x32xbf16>, vector<32x128xbf16>, vector<8x128xf32> -> vector<8x128xf32>
    %c0_3 = arith.constant 0 : index
    %c0_4 = arith.constant 0 : index
    %4 = vector.load %arg3[%c0_3, %c0_4] : memref<1x128xf32, #tpu.memory_space<vmem>>, vector<1x128xf32>
    %5 = vector.broadcast %4 : vector<1x128xf32> to vector<8x128xf32>
    %6 = arith.addf %3, %5 : vector<8x128xf32>
    %7 = arith.truncf %6 : vector<8x128xf32> to vector<8x128xbf16>
    %cst_5 = arith.constant 2.001950e-01 : bf16
    %8 = vector.broadcast %cst_5 : bf16 to vector<8x128xbf16>
    %9 = arith.mulf %8, %7 : vector<8x128xbf16>
    %10 = arith.maximumf %7, %9 : vector<8x128xbf16>
    %c0_6 = arith.constant 0 : index
    %c0_7 = arith.constant 0 : index
    %11 = vector.load %arg4[%c0_6, %c0_7] : memref<128x256xbf16, #tpu.memory_space<vmem>>, vector<128x256xbf16>
    %cst_8 = arith.constant dense<0.000000e+00> : vector<8x256xf32>
    %12 = tpu.matmul %10, %11, %cst_8 {dimension_numbers = #tpu.dot_dimension_numbers<[1], [0], [0], [1], [0, 0, 1, 1], [], []>} : vector<8x128xbf16>, vector<128x256xbf16>, vector<8x256xf32> -> vector<8x256xf32>
    %c0_9 = arith.constant 0 : index
    %c0_10 = arith.constant 0 : index
    %13 = vector.load %arg5[%c0_9, %c0_10] : memref<1x256xf32, #tpu.memory_space<vmem>>, vector<1x256xf32>
    %14 = vector.broadcast %13 : vector<1x256xf32> to vector<8x256xf32>
    %15 = arith.addf %12, %14 : vector<8x256xf32>
    %16 = arith.truncf %15 : vector<8x256xf32> to vector<8x256xbf16>
    %cst_11 = arith.constant 2.001950e-01 : bf16
    %17 = vector.broadcast %cst_11 : bf16 to vector<8x256xbf16>
    %18 = arith.mulf %17, %16 : vector<8x256xbf16>
    %19 = arith.maximumf %16, %18 : vector<8x256xbf16>
    %c0_12 = arith.constant 0 : index
    %c0_13 = arith.constant 0 : index
    %20 = vector.load %arg6[%c0_12, %c0_13] : memref<256x64xbf16, #tpu.memory_space<vmem>>, vector<256x64xbf16>
    %cst_14 = arith.constant dense<0.000000e+00> : vector<8x64xf32>
    %21 = tpu.matmul %19, %20, %cst_14 {dimension_numbers = #tpu.dot_dimension_numbers<[1], [0], [0], [1], [0, 0, 1, 1], [], []>} : vector<8x256xbf16>, vector<256x64xbf16>, vector<8x64xf32> -> vector<8x64xf32>
    %c0_15 = arith.constant 0 : index
    %c0_16 = arith.constant 0 : index
    %22 = vector.load %arg7[%c0_15, %c0_16] : memref<1x64xf32, #tpu.memory_space<vmem>>, vector<1x64xf32>
    %23 = vector.broadcast %22 : vector<1x64xf32> to vector<8x64xf32>
    %24 = arith.addf %21, %23 : vector<8x64xf32>
    %25 = arith.truncf %24 : vector<8x64xf32> to vector<8x64xbf16>
    %c0_17 = arith.constant 0 : index
    %c0_18 = arith.constant 0 : index
    %26 = vector.load %arg8[%c0_17, %c0_18] : memref<8x64xbf16, #tpu.memory_space<vmem>>, vector<8x64xbf16>
    tpu.vector_store %arg8[%c0_17, %c0_18], %25 {strides = array<i32>} : memref<8x64xbf16, #tpu.memory_space<vmem>>, vector<8x64xbf16>,
    return
  }
  func.func @transform_0(%arg0: i32) -> (i32, i32) {
    %c0_i32 = arith.constant 0 : i32
    %c0_i32_0 = arith.constant 0 : i32
    return %arg0, %c0_i32 : i32, i32
  }
  func.func @transform_1(%arg0: i32) -> (i32, i32) {
    %c0_i32 = arith.constant 0 : i32
    %c0_i32_0 = arith.constant 0 : i32
    %c0_i32_1 = arith.constant 0 : i32
    return %c0_i32, %c0_i32_0 : i32, i32
  }
  func.func @transform_2(%arg0: i32) -> (i32, i32) {
    %c0_i32 = arith.constant 0 : i32
    %c0_i32_0 = arith.constant 0 : i32
    %c0_i32_1 = arith.constant 0 : i32
    return %c0_i32, %c0_i32_0 : i32, i32
  }
  func.func @transform_3(%arg0: i32) -> (i32, i32) {
    %c0_i32 = arith.constant 0 : i32
    %c0_i32_0 = arith.constant 0 : i32
    %c0_i32_1 = arith.constant 0 : i32
    return %c0_i32, %c0_i32_0 : i32, i32
  }
  func.func @transform_4(%arg0: i32) -> (i32, i32) {
    %c0_i32 = arith.constant 0 : i32
    %c0_i32_0 = arith.constant 0 : i32
    %c0_i32_1 = arith.constant 0 : i32
    return %c0_i32, %c0_i32_0 : i32, i32
  }
  func.func @transform_5(%arg0: i32) -> (i32, i32) {
    %c0_i32 = arith.constant 0 : i32
    %c0_i32_0 = arith.constant 0 : i32
    %c0_i32_1 = arith.constant 0 : i32
    return %c0_i32, %c0_i32_0 : i32, i32
  }
  func.func @transform_6(%arg0: i32) -> (i32, i32) {
    %c0_i32 = arith.constant 0 : i32
    %c0_i32_0 = arith.constant 0 : i32
    %c0_i32_1 = arith.constant 0 : i32
    return %c0_i32, %c0_i32_0 : i32, i32
  }
  func.func @transform_7(%arg0: i32) -> (i32, i32) {
    %c0_i32 = arith.constant 0 : i32
    %c0_i32_0 = arith.constant 0 : i32
    return %arg0, %c0_i32 : i32, i32
  }
}

</mosaic_0001>

<bundles_post_ra>
// kernel: generator_forward.1
= control target key start
LH: loop header
LB: loop body
LE: loop exit
PB: predicated region body
PF: predicated region fallthrough
CT: control target
= control target key end

     0   :  { %v586_v1 = vmov 0.0   ;;  %vm587_vm0 = vmmov 0   ;;  %vm54_vm1 = vcmask 261120   ;;  %s747_s0 = inlined_call_operand.vmem [shape: f32[8,32], index: 0, kind: input, shape index: {}]   ;;  %s748_s1 = inlined_call_operand.vmem [shape: bf16[32,128], index: 1, kind: input, shape index: {}]   ;;  %s749_s2 = inlined_call_operand.vmem [shape: f32[1,128], index: 2, kind: input, shape index: {}]   ;;  %s750_s3 = inlined_call_operand.vmem [shape: bf16[128,256], index: 3, kind: input, shape index: {}]   ;;  %s751_s4 = inlined_call_operand.vmem [shape: f32[1,256], index: 4, kind: input, shape index: {}]   ;;  %s752_s5 = inlined_call_operand.vmem [shape: bf16[256,64], index: 5, kind: input, shape index: {}]   ;;  %s753_s6 = inlined_call_operand.vmem [shape: f32[1,64], index: 6, kind: input, shape index: {}]   ;;  %s754_s7 = inlined_call_operand.hbm [shape: bf16[8,64], index: 7, kind: output, shape index: {}]  }
   0x1   :  { %v522_v0 = vld [vmem:[%s748_s1 + $0x8] sm:$0xff]   ;;  %510 = vmatprep.subr.bf16.mxu0 %v586_v1  ;;  %v523_v2 = vld [vmem:[%s748_s1] sm:$0xff]   ;;  %514 = vmatprep.mubr.msk.bf16.mxu0 %vm587_vm0, %v586_v1  ;;  %v524_v4 = vld [vmem:[%s750_s3 + $0x74] ss:$8 sps:$4 sm:$0xff]  }
   0x2   :  { %511 = vmatpush3.bf16.msra.mxu0 %v522_v0  ;;  %v29_v3 = vld [vmem:[%s747_s0] sm:$0xff]  ;;  %v526_v5 = vld [vmem:[%s750_s3 + $0x70] ss:$8 sps:$4 sm:$0xff]   ;;  %209 = vmatprep.subr.bf16.mxu1 %v524_v4  ;;  %v530_v9 = vld [vmem:[%s750_s3 + $0x54] ss:$8 sps:$4 sm:$0xff]  }
   0x3   :  { %512 = vmatprep.subr.bf16.mxu0 %v586_v1  ;;  %v527_v6 = vld [vmem:[%s750_s3 + $0x64] ss:$8 sps:$4 sm:$0xff]   ;;  %v30_v7 = vpack.c.bf16 %v29_v3, %v29_v3  ;;  %210 = vmatpush1.bf16.msra.mxu1 %v526_v5  ;;  %v529_v8 = vld [vmem:[%s750_s3 + $0x60] ss:$8 sps:$4 sm:$0xff]   ;;  %v532_v10 = vld [vmem:[%s750_s3 + $0x50] ss:$8 sps:$4 sm:$0xff]  }
   0x4   :  { %211 = vmatprep.subr.bf16.mxu1 %v527_v6  ;;  %v533_v11 = vld [vmem:[%s750_s3 + $0x44] ss:$8 sps:$4 sm:$0xff]   ;;  %v535_v12 = vld [vmem:[%s750_s3 + $0x40] ss:$8 sps:$4 sm:$0xff]   ;;  %v536_v13 = vld [vmem:[%s750_s3 + $0x34] ss:$8 sps:$4 sm:$0xff]  }
   0x5   :  { %v538_v14 = vld [vmem:[%s750_s3 + $0x30] ss:$8 sps:$4 sm:$0xff]   ;;  %v539_v15 = vld [vmem:[%s750_s3 + $0x24] ss:$8 sps:$4 sm:$0xff]   ;;  %v541_v16 = vld [vmem:[%s750_s3 + $0x20] ss:$8 sps:$4 sm:$0xff]  }
   0x6   :  { %513 = vmatpush3.bf16.msra.mxu0 %v523_v2 }
   0x7   :  { %212 = vmatpush1.bf16.msra.mxu1 %v529_v8 }
   0x8   :  { %213 = vmatprep.subr.bf16.mxu1 %v530_v9 }
   0x9   :  { %515 = vmatmul.mubr.msk.bf16.vlgmr.msra.gmra.mxu0 %vm54_vm1, %v30_v7 }
   0xb   :  { %214 = vmatpush1.bf16.msra.mxu1 %v532_v10 }
   0xc   :  { %215 = vmatprep.subr.bf16.mxu1 %v533_v11 }
   0xf   :  { %216 = vmatpush1.bf16.msra.mxu1 %v535_v12 }
  0x10   :  { %217 = vmatprep.subr.bf16.mxu1 %v536_v13 }
  0x13   :  { %218 = vmatpush1.bf16.msra.mxu1 %v538_v14 }
  0x14   :  { %12 = vsyncpa [#allocation3], 0  ;;  %219 = vmatprep.subr.bf16.mxu1 %v539_v15  ;;  %v542_v17 = vld [vmem:[%s750_s3 + $0x14] ss:$8 sps:$4 sm:$0xff]   ;;  %v544_v18 = vld [vmem:[%s750_s3 + $0x10] ss:$8 sps:$4 sm:$0xff]   ;;  %v119_v47 = vlaneseq }
  0x15   :  { %v545_v19 = vld [vmem:[%s750_s3 + $0x4] ss:$8 sps:$4 sm:$0xff]   ;;  %v547_v20 = vld [vmem:[%s750_s3] ss:$8 sps:$4 sm:$0xff]   ;;  %v588_v21 = vmov 0   ;;  %v548_v22 = vld [vmem:[%s752_s5 + $0x78] sm:$0xff]  }
  0x16   :  { %241 = vmatprep.mubr.bf16.mxu1 %v588_v21  ;;  %v549_v23 = vld [vmem:[%s752_s5 + $0x38] sm:$0xff]   ;;  %v550_v24 = vld [vmem:[%s752_s5 + $0x70] sm:$0xff]   ;;  %488 = vmatprep.subr.bf16.mxu0 %v548_v22  ;;  %v552_v26 = vld [vmem:[%s752_s5 + $0x68] sm:$0xff]   ;;  %v120_v48 = vshrl.u32 %v119_v47, 7  ;;  %s589_s20 = smov [#allocation2]   ;;  %vm432_vm2 = vcmask 519168  }
  0x17   :  { %220 = vmatpush1.bf16.msra.mxu1 %v541_v16  ;;  %489 = vmatpush3.bf16.msra.mxu0 %v549_v23  ;;  %v551_v25 = vld [vmem:[%s752_s5 + $0x30] sm:$0xff]   ;;  %v553_v27 = vld [vmem:[%s752_s5 + $0x28] sm:$0xff]   ;;  %v554_v28 = vld [vmem:[%s752_s5 + $0x60] sm:$0xff]   ;;  %s440_s21 = sshll.u32 %s589_s20, 4  ;;  %s441_s21 = int_to_ptr.vmem [resolvable:$true] %s440_s21 }
  0x18   :  { %221 = vmatprep.subr.bf16.mxu1 %v542_v17  ;;  %490 = vmatprep.subr.bf16.mxu0 %v550_v24  ;;  %v555_v29 = vld [vmem:[%s752_s5 + $0x20] sm:$0xff]   ;;  %v556_v30 = vld [vmem:[%s752_s5 + $0x58] sm:$0xff]   ;;  %v558_v41 = vld [vmem:[%s752_s5 + $0x50] sm:$0xff]   ;;  %v121_v49 = vsub.s32 0, %v120_v48  ;;  %v125_v51 = vsub.s32 1, %v120_v48  ;;  %s564_s22 = scalar_lea.vmem %s441_s21, 64  ;;  %p569_p1 = scmp.lt.s32.totalorder %s441_s21, %s441_s21 }
  0x19   :  { %v557_v31 = vld [vmem:[%s752_s5 + $0x18] sm:$0xff]   ;;  %v448_v32 = vld [vmem:[%s749_s2] ss:$0 sm:$0xff]  ;;  %v559_v42 = vld [vmem:[%s752_s5 + $0x10] sm:$0xff]   ;;  %p565_p0 = scmp.ne.s32.totalorder %s441_s21, %s564_s22  ;;  %p570_p2 = scmp.lt.s32.totalorder %s564_s22, %s564_s22 }
  0x1a   :  { %v560_v43 = vld [vmem:[%s752_s5 + $0x48] sm:$0xff]   ;;  %v562_v45 = vld [vmem:[%s752_s5 + $0x40] sm:$0xff]  }
  0x1b   :  { %222 = vmatpush1.bf16.msra.mxu1 %v544_v18  ;;  %491 = vmatpush3.bf16.msra.mxu0 %v551_v25  ;;  %v561_v44 = vld [vmem:[%s752_s5 + $0x8] sm:$0xff]   ;;  %v563_v46 = vld [vmem:[%s752_s5] sm:$0xff]   ;;  %p571_p3 = por %p570_p2, %p569_p1 }
  0x1c   :  { %223 = vmatprep.subr.bf16.mxu1 %v545_v19  ;;  %492 = vmatprep.subr.bf16.mxu0 %v552_v26  ;;  %v117_v50 = vld [vmem:[%s751_s4] sm:$0x3] }
  0x1d   :  { %v122_v52 = vrot.slane %v117_v50, %v121_v49  ;;  %v126_v53 = vrot.slane %v117_v50, %v125_v51  ;;  %v468_v3 = vld [vmem:[%s753_s6] ss:$0 sm:$0xff]  ;;  %p572_p4 = pnand %p571_p3, %p565_p0 }
  0x1f   :  { %224 = vmatpush1.bf16.msra.mxu1 %v547_v20  ;;  %493 = vmatpush3.bf16.msra.mxu0 %v553_v27 }
  0x20   :  { %494 = vmatprep.subr.bf16.mxu0 %v554_v28 }
  0x23   :  { %495 = vmatpush3.bf16.msra.mxu0 %v555_v29 }
  0x24   :  { %496 = vmatprep.subr.bf16.mxu0 %v556_v30 }
  0x27   :  { %497 = vmatpush3.bf16.msra.mxu0 %v557_v31 }
  0x28   :  { %498 = vmatprep.subr.bf16.mxu0 %v558_v41 }
  0x2b   :  { %499 = vmatpush3.bf16.msra.mxu0 %v559_v42 }
  0x2c   :  { %500 = vmatprep.subr.bf16.mxu0 %v560_v43 }
  0x2f   :  { %501 = vmatpush3.bf16.msra.mxu0 %v561_v44 }
  0x30   :  { %502 = vmatprep.subr.bf16.mxu0 %v562_v45 }
  0x33   :  { %503 = vmatpush3.bf16.msra.mxu0 %v563_v46 }
  0xc9   :  { %v92_v33 = vpop.f32.mrf.mxu0 }
  0xca   :  { %v93_v34 = vadd.f32 %v448_v32, %v92_v33 }
  0xcb   :  { %v516_v35 = vpop.f32.mrf.mxu0 }
  0xcc   :  { %v98_v36 = vpack.c.bf16 %v93_v34, %v93_v34 }
  0xcd   :  { %v95_v37 = vpop.f32.mrf.mxu0 }
  0xce   :  { %v99_v38 = vmul.bf16 1045249613, %v98_v36 }
  0xcf   :  { %v517_v39 = vpop.f32.mrf.mxu0 }
  0xd0   :  { %v100_v40 = vmax.bf16 %v99_v38, %v98_v36 }
  0xd2   :  { %242 = vmatmul.mubr.bf16.vlgmr.msra.gmra.mxu1 %v100_v40 }
 0x192   :  { %v243_v54 = vpop.f32.mrf.mxu1 }
 0x193   :  { %v244_v55 = vadd.f32 %v243_v54, %v122_v52 }
 0x194   :  { %v245_v56 = vpop.f32.mrf.mxu1 }
 0x195   :  { %v250_v57 = vpack.c.bf16 %v244_v55, %v244_v55  ;;  %v246_v58 = vadd.f32 %v245_v56, %v126_v53 }
 0x196   :  { %v247_v59 = vpop.f32.mrf.mxu1 }
 0x197   :  { %v251_v60 = vpack.c.bf16 %v246_v58, %v246_v58  ;;  %v252_v61 = vmul.bf16 1045249613, %v250_v57 }
 0x198   :  { %v248_v62 = vpop.f32.mrf.mxu1 }
 0x199   :  { %v253_v63 = vmul.bf16 1045249613, %v251_v60  ;;  %v254_v1 = vmax.bf16 %v252_v61, %v250_v57 }
 0x19b   :  { %v255_v0 = vmax.bf16 %v253_v63, %v251_v60 }
 0x19d   :  { %423 = vmatprep.mubr.bf16.mxu0 %v255_v0 }
 0x19e   :  { %424 = vmatmul.mubr.bf16.vlgmr.msra.gmra.mxu0 %v254_v1 }
 0x25e   :  { %v504_v2 = vpop.f32.mrf.mxu0 }
 0x260   :  { %v505_v4 = vpop.f32.mrf.mxu0 }
 0x261   :  { %v506_v5 = vadd.f32 %v505_v4, %v504_v2 }
 0x262   :  { %v507_v6 = vpop.f32.mrf.mxu0 }
 0x263   :  { %v426_v7 = vadd.f32 %v506_v5, %v468_v3 }
 0x264   :  { %v508_v8 = vpop.f32.mrf.mxu0 }
 0x265   :  { %v431_v9 = vpack.c.bf16 %v426_v7, %v426_v7 }
 0x267   :  { %433 = vst.msk [vmem:[#allocation2] sm:$0xf] %vm432_vm2, %v431_v9 }
 0x268   :  { %575 = shalt.err (!%p572_p4)
}
 0x269   :  { %443 = dma.vmem_to_hbm [thread:$0]  %s441_s21, 64, %s754_s7, [#allocation3]  }
 0x26a   :  { %584 = dma.done.wait [#allocation3], 64  }
 0x26b   :  { %585 = vsyncadd [#allocation3], 4294967232 }
 0x26c   :  { %447 = vsyncpa [#allocation3], 1 }

</bundles_post_ra>
